<compile_context>
chip_gen: v7x
topology: tpu7x:2x2x1
jax: 0.10.0
libtpu: 0.0.40
codegen_flags: <defaults>
</compile_context>

<pallas_src>
import jax
import jax.numpy as jnp
from jax import lax
from jax.experimental import pallas as pl
from jax.experimental.pallas import tpu as pltpu


def _round_up(x, m):
    return ((x + m - 1) // m) * m


# ---------------------------------------------------------------------------
# Pallas kernel: fused (im2col-matmul) conv + folded BatchNorm + ReLU
# ---------------------------------------------------------------------------
def _conv_bn_relu_kernel(p_ref, w_ref, scale_ref, shift_ref, o_ref):
    acc = jnp.dot(p_ref[...], w_ref[...], preferred_element_type=jnp.float32)
    y = acc * scale_ref[...] + shift_ref[...]            # folded BN (+ conv bias)
    o_ref[...] = jnp.maximum(y, 0.0).astype(o_ref.dtype)


def _conv_bn_relu_matmul(patches, w_kn, scale, shift):
    """relu((P @ W) * scale + shift) on the MXU.

    patches: (M, K) f32, w_kn: (K, N) f32, scale/shift: (N,) f32 -> (M, N) f32.
    Pads M/K/N to lane/sublane-friendly sizes, feeds the MXU bf16 inputs with
    f32 accumulation, slices padding off before returning.
    """
    M, K = patches.shape
    _, N = w_kn.shape

    Np = _round_up(N, 128)                 # lane-dense output columns
    Kp = _round_up(K, 128)                 # lane-dense contraction dim
    TM = 512 if M >= 512 else _round_up(M, 8)
    Mp = _round_up(M, TM)

    p_pad = jnp.pad(patches, ((0, Mp - M), (0, Kp - K))).astype(jnp.bfloat16)
    w_pad = jnp.pad(w_kn, ((0, Kp - K), (0, Np - N))).astype(jnp.bfloat16)
    scale_pad = jnp.pad(scale, (0, Np - N)).reshape(1, Np)
    shift_pad = jnp.pad(shift, (0, Np - N)).reshape(1, Np)

    cost = pl.CostEstimate(
        flops=2 * Mp * Kp * Np,
        transcendentals=0,
        bytes_accessed=Mp * Kp * 2 + Kp * Np * 2 + 2 * Np * 4 + Mp * Np * 4,
    )
    out = pl.pallas_call(
        _conv_bn_relu_kernel,
        out_shape=jax.ShapeDtypeStruct((Mp, Np), jnp.float32),
        grid=(Mp // TM,),
        in_specs=[
            pl.BlockSpec((TM, Kp), lambda i: (i, 0)),
            pl.BlockSpec((Kp, Np), lambda i: (0, 0)),
            pl.BlockSpec((1, Np), lambda i: (0, 0)),
            pl.BlockSpec((1, Np), lambda i: (0, 0)),
        ],
        out_specs=pl.BlockSpec((TM, Np), lambda i: (i, 0)),
        compiler_params=pltpu.CompilerParams(
            dimension_semantics=("parallel",)),
        cost_estimate=cost,
    )(p_pad, w_pad, scale_pad, shift_pad)
    return out[:M, :N]


# ---------------------------------------------------------------------------
# Wrapper glue: channels-last im2col, BN folding, NCHW module boundary
# ---------------------------------------------------------------------------
def _im2col_nhwc(x_nhwc, kh, kw, stride, pad):
    """(B, H, W, C) -> patches (B*Ho*Wo, kh*kw*C) with (kh, kw, C) order, C fastest."""
    B, H, W, C = x_nhwc.shape
    xp = jnp.pad(x_nhwc, ((0, 0), (pad, pad), (pad, pad), (0, 0)))
    Ho = (H + 2 * pad - kh) // stride + 1
    Wo = (W + 2 * pad - kw) // stride + 1
    cols = []
    for i in range(kh):
        for j in range(kw):
            cols.append(lax.slice(
                xp,
                (0, i, j, 0),
                (B, i + (Ho - 1) * stride + 1, j + (Wo - 1) * stride + 1, C),
                (1, stride, stride, 1)))
    patches = jnp.concatenate(cols, axis=-1)            # (B, Ho, Wo, kh*kw*C)
    return patches.reshape(B * Ho * Wo, kh * kw * C), Ho, Wo


def standard_conv_nhwc(x_nhwc, params, stride, pad):
    """Fused Conv2d + BatchNorm2d(eval) + ReLU; NHWC in / NHWC out."""
    w, b, gamma, beta, mean, var = params
    Cout, Cin, kh, kw = w.shape
    B = x_nhwc.shape[0]
    patches, Ho, Wo = _im2col_nhwc(x_nhwc, kh, kw, stride, pad)
    # (Cout, Cin, kh, kw) -> (kh*kw*Cin, Cout), matching the patch K ordering.
    w_kn = w.transpose(2, 3, 1, 0).reshape(kh * kw * Cin, Cout)
    eps = 1e-5
    scale = gamma / jnp.sqrt(var + eps)                 # (Cout,)
    shift = beta + (b - mean) * scale                   # conv bias folded into BN shift
    out = _conv_bn_relu_matmul(patches, w_kn, scale, shift)
    return out.reshape(B, Ho, Wo, Cout)


def standard_conv(x_nchw, params, stride, pad):
    """PyTorch-facing StandardConv: NCHW in / NCHW out."""
    y = standard_conv_nhwc(x_nchw.transpose(0, 2, 3, 1), params, stride, pad)
    return y.transpose(0, 3, 1, 2)


# ---------------------------------------------------------------------------
# Pure-JAX reference + deterministic init (for self-check)
# ---------------------------------------------------------------------------
def standard_conv_reference(x_nchw, params, stride, pad):
    w, b, gamma, beta, mean, var = params
    y = lax.conv_general_dilated(
        x_nchw, w, (stride, stride), [(pad, pad), (pad, pad)],
        dimension_numbers=("NCHW", "OIHW", "NCHW"))
    y = y + b[None, :, None, None]
    eps = 1e-5
    y = (y - mean[None, :, None, None]) * (
        gamma[None, :, None, None] / jnp.sqrt(var[None, :, None, None] + eps)
    ) + beta[None, :, None, None]
    return jnp.maximum(y, 0.0)


def init_standard_conv(key, cin, cout, k):
    """PyTorch-style conv init + non-trivial eval-mode BN running statistics."""
    wkey, bkey, gkey, b2key, mkey, vkey = jax.random.split(key, 6)
    fan_in = cin * k * k
    bound = 1.0 / (fan_in ** 0.5)
    w = jax.random.uniform(wkey, (cout, cin, k, k), jnp.float32, -bound, bound)
    b = jax.random.uniform(bkey, (cout,), jnp.float32, -bound, bound)
    gamma = 1.0 + 0.1 * jax.random.normal(gkey, (cout,), jnp.float32)
    beta = 0.1 * jax.random.normal(b2key, (cout,), jnp.float32)
    mean = 0.1 * jax.random.normal(mkey, (cout,), jnp.float32)
    var = 1.0 + 0.1 * jax.random.uniform(vkey, (cout,), jnp.float32)
    return (w, b, gamma, beta, mean, var)


if __name__ == "__main__":
    key = jax.random.PRNGKey(0)
    xkey, p1key, p2key = jax.random.split(key, 3)
    x = jax.random.normal(xkey, (2, 4, 16, 16), jnp.float32)   # NCHW

    configs = [
        # (params, stride, padding)
        (init_standard_conv(p1key, 4, 42, 5), 2, 2),   # (2,4,16,16) -> (2,42,8,8)
        (init_standard_conv(p2key, 4, 10, 3), 1, 1),   # (2,4,16,16) -> (2,10,16,16)
    ]

    fwd = jax.jit(standard_conv, static_argnums=(2, 3))
    for params, stride, pad in configs:
        out = jax.block_until_ready(fwd(x, params, stride, pad))
        ref = standard_conv_reference(x, params, stride, pad)
        assert out.shape == ref.shape, (out.shape, ref.shape)
        assert bool(jnp.all(jnp.isfinite(out)))
        max_err = float(jnp.max(jnp.abs(out - ref)))
        assert max_err < 5e-2, max_err                 # bf16-matmul tolerance
    print("KERNEL_OK")
</pallas_src>

<mosaic_0001>
module attributes {stable_mosaic.version = 11 : i64} {
  func.func @_conv_bn_relu_kernel(%arg0: i32, %arg1: memref<128x128xbf16, #tpu.memory_space<vmem>>, %arg2: memref<128x128xbf16, #tpu.memory_space<vmem>>, %arg3: memref<1x128xf32, #tpu.memory_space<vmem>>, %arg4: memref<1x128xf32, #tpu.memory_space<vmem>>, %arg5: memref<128x128xf32, #tpu.memory_space<vmem>>) attributes {dimension_semantics = [#tpu.dimension_semantics<parallel>], iteration_bounds = array<i64: 1>, scalar_prefetch = 0 : i64, scratch_operands = 0 : i64, tpu.core_type = #tpu.core_type<tc>, window_params = [{transform_indices = @transform_0, window_bounds = array<i64: 128, 128>}, {pipeline_mode = #tpu.pipeline_mode<synchronous>, transform_indices = @transform_1, window_bounds = array<i64: 128, 128>}, {pipeline_mode = #tpu.pipeline_mode<synchronous>, transform_indices = @transform_2, window_bounds = array<i64: 1, 128>}, {pipeline_mode = #tpu.pipeline_mode<synchronous>, transform_indices = @transform_3, window_bounds = array<i64: 1, 128>}, {transform_indices = @transform_4, window_bounds = array<i64: 128, 128>}]} {
    %c0 = arith.constant 0 : index
    %c0_0 = arith.constant 0 : index
    %0 = vector.load %arg1[%c0, %c0_0] : memref<128x128xbf16, #tpu.memory_space<vmem>>, vector<128x128xbf16>
    %c0_1 = arith.constant 0 : index
    %c0_2 = arith.constant 0 : index
    %1 = vector.load %arg2[%c0_1, %c0_2] : memref<128x128xbf16, #tpu.memory_space<vmem>>, vector<128x128xbf16>
    %cst = arith.constant dense<0.000000e+00> : vector<128x128xf32>
    %2 = tpu.matmul %0, %1, %cst {dimension_numbers = #tpu.dot_dimension_numbers<[1], [0], [0], [1], [0, 0, 1, 1], [], []>} : vector<128x128xbf16>, vector<128x128xbf16>, vector<128x128xf32> -> vector<128x128xf32>
    %c0_3 = arith.constant 0 : index
    %c0_4 = arith.constant 0 : index
    %3 = vector.load %arg3[%c0_3, %c0_4] : memref<1x128xf32, #tpu.memory_space<vmem>>, vector<1x128xf32>
    %4 = vector.broadcast %3 : vector<1x128xf32> to vector<128x128xf32>
    %5 = arith.mulf %2, %4 : vector<128x128xf32>
    %c0_5 = arith.constant 0 : index
    %c0_6 = arith.constant 0 : index
    %6 = vector.load %arg4[%c0_5, %c0_6] : memref<1x128xf32, #tpu.memory_space<vmem>>, vector<1x128xf32>
    %7 = vector.broadcast %6 : vector<1x128xf32> to vector<128x128xf32>
    %8 = arith.addf %5, %7 : vector<128x128xf32>
    %cst_7 = arith.constant 0.000000e+00 : f32
    %9 = vector.broadcast %cst_7 : f32 to vector<128x128xf32>
    %10 = arith.maximumf %8, %9 : vector<128x128xf32>
    %c0_8 = arith.constant 0 : index
    %c0_9 = arith.constant 0 : index
    %11 = vector.load %arg5[%c0_8, %c0_9] : memref<128x128xf32, #tpu.memory_space<vmem>>, vector<128x128xf32>
    tpu.vector_store %arg5[%c0_8, %c0_9], %10 {strides = array<i32>} : memref<128x128xf32, #tpu.memory_space<vmem>>, vector<128x128xf32>,
    return
  }
  func.func @transform_0(%arg0: i32) -> (i32, i32) {
    %c0_i32 = arith.constant 0 : i32
    %c0_i32_0 = arith.constant 0 : i32
    return %arg0, %c0_i32 : i32, i32
  }
  func.func @transform_1(%arg0: i32) -> (i32, i32) {
    %c0_i32 = arith.constant 0 : i32
    %c0_i32_0 = arith.constant 0 : i32
    %c0_i32_1 = arith.constant 0 : i32
    return %c0_i32, %c0_i32_0 : i32, i32
  }
  func.func @transform_2(%arg0: i32) -> (i32, i32) {
    %c0_i32 = arith.constant 0 : i32
    %c0_i32_0 = arith.constant 0 : i32
    %c0_i32_1 = arith.constant 0 : i32
    return %c0_i32, %c0_i32_0 : i32, i32
  }
  func.func @transform_3(%arg0: i32) -> (i32, i32) {
    %c0_i32 = arith.constant 0 : i32
    %c0_i32_0 = arith.constant 0 : i32
    %c0_i32_1 = arith.constant 0 : i32
    return %c0_i32, %c0_i32_0 : i32, i32
  }
  func.func @transform_4(%arg0: i32) -> (i32, i32) {
    %c0_i32 = arith.constant 0 : i32
    %c0_i32_0 = arith.constant 0 : i32
    return %arg0, %c0_i32 : i32, i32
  }
}

</mosaic_0001>

<bundles_post_ra>
// kernel: standard_conv.1
= control target key start
LH: loop header
LB: loop body
LE: loop exit
PB: predicated region body
PF: predicated region fallthrough
CT: control target
= control target key end

     0   :  { %s575_s0 = inlined_call_operand.vmem [shape: bf16[128,128], index: 0, kind: input, shape index: {}]   ;;  %s576_s1 = inlined_call_operand.vmem [shape: bf16[128,128], index: 1, kind: input, shape index: {}]   ;;  %s577_s2 = inlined_call_operand.vmem [shape: f32[1,128], index: 2, kind: input, shape index: {}]   ;;  %s578_s3 = inlined_call_operand.vmem [shape: f32[1,128], index: 3, kind: input, shape index: {}]   ;;  %s579_s4 = inlined_call_operand.hbm [shape: f32[128,128], index: 4, kind: output, shape index: {}]  }
   0x1   :  { %v423_v0 = vld [vmem:[%s576_s1] sm:$0xff]   ;;  %v424_v1 = vld [vmem:[%s576_s1 + $0x8] sm:$0xff]   ;;  %v425_v2 = vld [vmem:[%s576_s1 + $0x10] sm:$0xff]  }
   0x2   :  { %372 = vmatprep.subr.bf16.mxu0 %v423_v0  ;;  %404 = vmatprep.subr.bf16.mxu1 %v423_v0  ;;  %v426_v3 = vld [vmem:[%s576_s1 + $0x18] sm:$0xff]   ;;  %v431_v4 = vld [vmem:[%s575_s0] sm:$0xff]   ;;  %v428_v7 = vld [vmem:[%s576_s1 + $0x28] sm:$0xff]  }
   0x3   :  { %373 = vmatpush3.bf16.msra.mxu0 %v423_v0  ;;  %412 = vmatpush3.bf16.msra.mxu1 %v423_v0  ;;  %v432_v5 = vld [vmem:[%s575_s0 + $0x20] sm:$0xff]  }
   0x4   :  { %374 = vmatprep.subr.bf16.mxu0 %v424_v1  ;;  %405 = vmatprep.subr.bf16.mxu1 %v424_v1  ;;  %v427_v6 = vld [vmem:[%s576_s1 + $0x20] sm:$0xff]  }
   0x5   :  { %388 = vmatprep.mubr.bf16.mxu0 %v431_v4  ;;  %396 = vmatprep.mubr.bf16.mxu1 %v432_v5 }
   0x7   :  { %375 = vmatpush3.bf16.msra.mxu0 %v424_v1  ;;  %413 = vmatpush3.bf16.msra.mxu1 %v424_v1 }
   0x8   :  { %376 = vmatprep.subr.bf16.mxu0 %v425_v2  ;;  %406 = vmatprep.subr.bf16.mxu1 %v425_v2 }
   0xb   :  { %377 = vmatpush3.bf16.msra.mxu0 %v425_v2  ;;  %414 = vmatpush3.bf16.msra.mxu1 %v425_v2 }
   0xc   :  { %378 = vmatprep.subr.bf16.mxu0 %v426_v3  ;;  %407 = vmatprep.subr.bf16.mxu1 %v426_v3 }
   0xf   :  { %379 = vmatpush3.bf16.msra.mxu0 %v426_v3  ;;  %415 = vmatpush3.bf16.msra.mxu1 %v426_v3 }
  0x10   :  { %380 = vmatprep.subr.bf16.mxu0 %v427_v6  ;;  %408 = vmatprep.subr.bf16.mxu1 %v427_v6 }
  0x11   :  { %9 = vsyncpa [#allocation3], 0  ;;  %v429_v8 = vld [vmem:[%s576_s1 + $0x30] sm:$0xff]   ;;  %v430_v9 = vld [vmem:[%s576_s1 + $0x38] sm:$0xff]  }
  0x12   :  { %v433_v10 = vld [vmem:[%s575_s0 + $0x8] sm:$0xff]   ;;  %v435_v12 = vld [vmem:[%s575_s0 + $0x10] sm:$0xff]   ;;  %v437_v14 = vld [vmem:[%s575_s0 + $0x18] sm:$0xff]  }
  0x13   :  { %381 = vmatpush3.bf16.msra.mxu0 %v427_v6  ;;  %416 = vmatpush3.bf16.msra.mxu1 %v427_v6  ;;  %v434_v11 = vld [vmem:[%s575_s0 + $0x28] sm:$0xff]   ;;  %v436_v13 = vld [vmem:[%s575_s0 + $0x30] sm:$0xff]   ;;  %v438_v15 = vld [vmem:[%s575_s0 + $0x38] sm:$0xff]   ;;  %s463_s0 = smov [#allocation2]  }
  0x14   :  { %382 = vmatprep.subr.bf16.mxu0 %v428_v7  ;;  %409 = vmatprep.subr.bf16.mxu1 %v428_v7  ;;  %v354_v16 = vld [vmem:[%s577_s2] ss:$0 sm:$0xff]  ;;  %s327_s2 = sshll.u32 %s463_s0, 4  ;;  %s328_s2 = int_to_ptr.vmem [resolvable:$true] %s327_s2 }
  0x15   :  { %v545_v18 = vld [vmem:[%s578_s3] ss:$0 sm:$0xff]  ;;  %s439_s3 = scalar_lea.vmem %s328_s2, 2048  ;;  %p444_p1 = scmp.lt.s32.totalorder %s328_s2, %s328_s2 }
  0x16   :  { %p440_p0 = scmp.ne.s32.totalorder %s328_s2, %s439_s3  ;;  %p445_p2 = scmp.lt.s32.totalorder %s439_s3, %s439_s3 }
  0x17   :  { %383 = vmatpush3.bf16.msra.mxu0 %v428_v7  ;;  %417 = vmatpush3.bf16.msra.mxu1 %v428_v7 }
  0x18   :  { %384 = vmatprep.subr.bf16.mxu0 %v429_v8  ;;  %410 = vmatprep.subr.bf16.mxu1 %v429_v8  ;;  %p446_p3 = por %p445_p2, %p444_p1 }
  0x1a   :  { %p447_p4 = pnand %p446_p3, %p440_p0 }
  0x1b   :  { %385 = vmatpush3.bf16.msra.mxu0 %v429_v8  ;;  %418 = vmatpush3.bf16.msra.mxu1 %v429_v8 }
  0x1c   :  { %386 = vmatprep.subr.bf16.mxu0 %v430_v9  ;;  %411 = vmatprep.subr.bf16.mxu1 %v430_v9 }
  0x1f   :  { %387 = vmatpush3.bf16.msra.mxu0 %v430_v9  ;;  %419 = vmatpush3.bf16.msra.mxu1 %v430_v9 }
  0x22   :  { %389 = vmatmul.mubr.bf16.vlgmr.msra.gmra.mrb[0].mxu0 %v433_v10  ;;  %397 = vmatmul.mubr.bf16.vlgmr.msra.gmra.mrb[0].mxu1 %v434_v11 }
  0x23   :  { %392 = vmatprep.mubr.bf16.mxu0 %v435_v12  ;;  %400 = vmatprep.mubr.bf16.mxu1 %v436_v13 }
  0x2a   :  { %393 = vmatmul.mubr.bf16.gmra.mrb[4].mxu0 %v437_v14  ;;  %401 = vmatmul.mubr.bf16.gmra.mrb[4].mxu1 %v438_v15 }
  0xf5   :  { %v390_v17 = vpop.f32.mrb[0].mxu0  ;;  %v398_v19 = vpop.f32.mrb[0].mxu1 }
  0xf6   :  { %v253_v20 = vmul.f32 %v390_v17, %v354_v16  ;;  %v261_v21 = vmul.f32 %v398_v19, %v354_v16  ;;  %v181_v22 = vpop.f32.mrb[1].mxu0  ;;  %v213_v23 = vpop.f32.mrb[1].mxu1 }
  0xf7   :  { %v251_v24 = vmul.f32 %v354_v16, %v181_v22  ;;  %v259_v25 = vmul.f32 %v354_v16, %v213_v23  ;;  %v391_v26 = vpop.f32.mrb[2].mxu0  ;;  %v399_v27 = vpop.f32.mrb[2].mxu1 }
  0xf8   :  { %v276_v28 = vadd.f32 %v545_v18, %v253_v20  ;;  %v284_v29 = vadd.f32 %v545_v18, %v261_v21  ;;  %v254_v30 = vmul.f32 %v391_v26, %v354_v16  ;;  %v262_v31 = vmul.f32 %v399_v27, %v354_v16  ;;  %v184_v32 = vpop.f32.mrb[3].mxu0  ;;  %v216_v33 = vpop.f32.mrb[3].mxu1 }
  0xf9   :  { %v274_v34 = vadd.f32 %v545_v18, %v251_v24  ;;  %v282_v35 = vadd.f32 %v545_v18, %v259_v25  ;;  %v252_v36 = vmul.f32 %v354_v16, %v184_v32  ;;  %v260_v37 = vmul.f32 %v354_v16, %v216_v33 }
  0xfa   :  { %v292_v38 = vmax.f32 %v276_v28, 0.0  ;;  %v300_v39 = vmax.f32 %v284_v29, 0.0  ;;  %v277_v40 = vadd.f32 %v545_v18, %v254_v30  ;;  %v285_v41 = vadd.f32 %v545_v18, %v262_v31 }
  0xfb   :  { %v290_v42 = vmax.f32 %v274_v34, 0.0  ;;  %v298_v43 = vmax.f32 %v282_v35, 0.0  ;;  %v275_v44 = vadd.f32 %v545_v18, %v252_v36  ;;  %v283_v45 = vadd.f32 %v545_v18, %v260_v37 }
  0xfc   :  { %308 = vst [vmem:[#allocation2 + $0x10] sm:$0xff] %v292_v38  ;;  %316 = vst [vmem:[#allocation2 + $0x50] sm:$0xff] %v300_v39  ;;  %v293_v46 = vmax.f32 %v277_v40, 0.0  ;;  %v301_v47 = vmax.f32 %v285_v41, 0.0 }
  0xfd   :  { %306 = vst [vmem:[#allocation2] sm:$0xff] %v290_v42  ;;  %314 = vst [vmem:[#allocation2 + $0x40] sm:$0xff] %v298_v43  ;;  %v291_v48 = vmax.f32 %v275_v44, 0.0  ;;  %v299_v49 = vmax.f32 %v283_v45, 0.0  ;;  %v394_v50 = vpop.f32.mrb[4].mxu0  ;;  %v402_v51 = vpop.f32.mrb[4].mxu1 }
  0xfe   :  { %309 = vst [vmem:[#allocation2 + $0x18] sm:$0xff] %v293_v46  ;;  %317 = vst [vmem:[#allocation2 + $0x58] sm:$0xff] %v301_v47  ;;  %v257_v52 = vmul.f32 %v394_v50, %v354_v16  ;;  %v265_v53 = vmul.f32 %v402_v51, %v354_v16  ;;  %v197_v54 = vpop.f32.mrb[5].mxu0  ;;  %v229_v55 = vpop.f32.mrb[5].mxu1 }
  0xff   :  { %307 = vst [vmem:[#allocation2 + $0x8] sm:$0xff] %v291_v48  ;;  %315 = vst [vmem:[#allocation2 + $0x48] sm:$0xff] %v299_v49  ;;  %v255_v56 = vmul.f32 %v354_v16, %v197_v54  ;;  %v263_v57 = vmul.f32 %v354_v16, %v229_v55  ;;  %v395_v58 = vpop.f32.mrb[6].mxu0  ;;  %v403_v59 = vpop.f32.mrb[6].mxu1 }
 0x100   :  { %v280_v60 = vadd.f32 %v545_v18, %v257_v52  ;;  %v288_v61 = vadd.f32 %v545_v18, %v265_v53  ;;  %v258_v62 = vmul.f32 %v395_v58, %v354_v16  ;;  %v266_v63 = vmul.f32 %v403_v59, %v354_v16  ;;  %v200_v0 = vpop.f32.mrb[7].mxu0  ;;  %v232_v1 = vpop.f32.mrb[7].mxu1 }
 0x101   :  { %v278_v2 = vadd.f32 %v545_v18, %v255_v56  ;;  %v286_v3 = vadd.f32 %v545_v18, %v263_v57  ;;  %v256_v4 = vmul.f32 %v354_v16, %v200_v0  ;;  %v264_v5 = vmul.f32 %v354_v16, %v232_v1 }
 0x102   :  { %v296_v6 = vmax.f32 %v280_v60, 0.0  ;;  %v304_v7 = vmax.f32 %v288_v61, 0.0  ;;  %v281_v8 = vadd.f32 %v545_v18, %v258_v62  ;;  %v289_v9 = vadd.f32 %v545_v18, %v266_v63 }
 0x103   :  { %v294_v10 = vmax.f32 %v278_v2, 0.0  ;;  %v302_v11 = vmax.f32 %v286_v3, 0.0  ;;  %v279_v12 = vadd.f32 %v545_v18, %v256_v4  ;;  %v287_v13 = vadd.f32 %v545_v18, %v264_v5 }
 0x104   :  { %312 = vst [vmem:[#allocation2 + $0x30] sm:$0xff] %v296_v6  ;;  %320 = vst [vmem:[#allocation2 + $0x70] sm:$0xff] %v304_v7  ;;  %v297_v14 = vmax.f32 %v281_v8, 0.0  ;;  %v305_v15 = vmax.f32 %v289_v9, 0.0 }
 0x105   :  { %310 = vst [vmem:[#allocation2 + $0x20] sm:$0xff] %v294_v10  ;;  %318 = vst [vmem:[#allocation2 + $0x60] sm:$0xff] %v302_v11  ;;  %v295_v16 = vmax.f32 %v279_v12, 0.0  ;;  %v303_v17 = vmax.f32 %v287_v13, 0.0 }
 0x106   :  { %313 = vst [vmem:[#allocation2 + $0x38] sm:$0xff] %v297_v14  ;;  %321 = vst [vmem:[#allocation2 + $0x78] sm:$0xff] %v305_v15 }
 0x107   :  { %311 = vst [vmem:[#allocation2 + $0x28] sm:$0xff] %v295_v16  ;;  %319 = vst [vmem:[#allocation2 + $0x68] sm:$0xff] %v303_v17 }
 0x108   :  { %450 = shalt.err (!%p447_p4)
}
 0x109   :  { %s451_s26 = scalar_lea.hbm %s579_s4, 2048 }
 0x10a   :  { %p452_p5 = scmp.ne.s32.totalorder %s579_s4, %s451_s26  ;;  %p455_p6 = scmp.lt.u32.totalorder %s451_s26, %s579_s4 }
 0x10c   :  { %p457_p7 = pnand %p455_p6, %p452_p5 }
 0x10e   :  { %460 = shalt.err (!%p457_p7)
}
 0x10f   :  { %s464_s5 = smov 128   ;;  %s465_s6 = smov 8  }
 0x110   :  { %333 = dma.vmem_to_hbm [thread:$0]  %s328_s2, 2048, %s579_s4, [#allocation3], %s464_s5, %s464_s5, %s465_s6  }
 0x111   :  { %461 = dma.done.wait [#allocation3], 2048  }
 0x112   :  { %462 = vsyncadd [#allocation3], 4294965248 }
 0x113   :  { %337 = vsyncpa [#allocation3], 1 }

</bundles_post_ra>
